<compile_context>
chip_gen: v7x
topology: tpu7x:2x2x1
jax: 0.10.0
libtpu: 0.0.40
codegen_flags: <defaults>
</compile_context>

<pallas_src>
import functools

import jax
import jax.numpy as jnp
from jax.experimental import pallas as pl
from jax.experimental.pallas import tpu as pltpu


def _round_up(x, m):
    return (x + m - 1) // m * m


def _pick_batch_block(batch, max_block=1024):
    # Aim for >= 2 grid steps when the batch allows it (megacore on v7x) while
    # keeping a multiple-of-8 sublane tile; the cdiv grid + wrapper padding
    # handles any remainder, so no even-divisor fallback is needed.
    half = _round_up(max(1, (batch + 1) // 2), 8)
    return max(8, min(max_block, half))


def _fused_embedding_kernel(
    ids_ref,     # (TB, M+4) int32 : [map, cmd0, cmd1, ai, mut_0 .. mut_{M-1}]
    mask_ref,    # (TB, M)   float32 mutation mask
    table_ref,   # (K_pad, total_dim) float32 block-diagonal fused table (+ bias row)
    out_ref,     # (TB, total_dim) float32
    *,
    off_cmd0,
    off_cmd1,
    off_mut,
    off_ai,
    bias_row,
    mask_eps,
):
    f32 = jnp.float32
    tb = ids_ref.shape[0]
    k_rows = table_ref.shape[0]

    ids = ids_ref[...]
    # One selector-row iota reused by every field (stays on the VPU).
    iota = jax.lax.broadcasted_iota(jnp.int32, (tb, k_rows), 1)

    # Unweighted bands (map, cmd slot 0, cmd slot 1, ai) plus the constant bias
    # column: boolean OR chain, single cast to f32 -> fewer VALU ops and fewer
    # live (TB, K) f32 temporaries than per-band casts/adds.
    sel_b = iota == ids[:, 0:1]                                  # map band (offset 0)
    sel_b = jnp.logical_or(sel_b, iota == ids[:, 1:2] + off_cmd0)
    sel_b = jnp.logical_or(sel_b, iota == ids[:, 2:3] + off_cmd1)
    sel_b = jnp.logical_or(sel_b, iota == ids[:, 3:4] + off_ai)
    sel_b = jnp.logical_or(sel_b, iota == bias_row)              # bias folded into table
    sel = sel_b.astype(f32)

    # Mutation masked mean: fold mask / denom into the selector weights so the
    # reduction happens inside the single MXU matmul (no 3-D one-hot, no big
    # cross-sublane reduce).
    mask = mask_ref[...]                                         # (TB, M)
    inv_denom = 1.0 / (jnp.sum(mask, axis=1, keepdims=True) + mask_eps)
    num_slots = mask_ref.shape[1]
    for m in range(num_slots):        # M is small — fully unrolled, stays 2-D
        w_m = mask[:, m:m + 1] * inv_denom
        sel = sel + (iota == ids[:, 4 + m:5 + m] + off_mut).astype(f32) * w_m

    # Single block-diagonal MXU push produces every output column band plus the
    # commander bias at once; output block is the final (TB, total_dim) slab.
    out_ref[...] = jnp.dot(sel, table_ref[...], preferred_element_type=f32)


def build_fused_feature_embedding(params):
    """Run ONCE at model init: fold the commander Linear (and its bias) into a
    block-diagonal fused table. Returns the state consumed by the forward."""
    map_t = params["map_table"].astype(jnp.float32)
    cmd_t = params["commander_table"].astype(jnp.float32)
    mut_t = params["mutation_table"].astype(jnp.float32)
    ai_t = params["ai_table"].astype(jnp.float32)
    w = params["combine_w"].astype(jnp.float32)       # (2*Dc, Dc), used as x @ w + b
    b = params["combine_b"].astype(jnp.float32).reshape(1, -1)

    map_dim, cmd_dim = map_t.shape[1], cmd_t.shape[1]
    mut_dim, ai_dim = mut_t.shape[1], ai_t.shape[1]
    total_dim = map_dim + cmd_dim + mut_dim + ai_dim

    hi = jax.lax.Precision.HIGHEST
    t0 = jnp.dot(cmd_t, w[:cmd_dim], precision=hi)    # commander slot-0 fold
    t1 = jnp.dot(cmd_t, w[cmd_dim:], precision=hi)    # commander slot-1 fold

    num_maps, num_cmd = map_t.shape[0], cmd_t.shape[0]
    num_mut, num_ais = mut_t.shape[0], ai_t.shape[0]
    k_real = num_maps + 2 * num_cmd + num_mut + num_ais + 1   # +1 bias row
    k_pad = _round_up(k_real, 8)                              # clean MXU / sublane feed

    c0 = map_dim
    c1 = map_dim + cmd_dim
    c2 = c1 + mut_dim

    table = jnp.zeros((k_pad, total_dim), jnp.float32)
    r = 0
    table = table.at[r:r + num_maps, 0:c0].set(map_t); r += num_maps
    table = table.at[r:r + num_cmd, c0:c1].set(t0);    r += num_cmd
    table = table.at[r:r + num_cmd, c0:c1].set(t1);    r += num_cmd
    table = table.at[r:r + num_mut, c1:c2].set(mut_t); r += num_mut
    table = table.at[r:r + num_ais, c2:].set(ai_t);    r += num_ais
    table = table.at[r:r + 1, c0:c1].set(b)                    # bias row

    return dict(
        table=table,
        num_maps=num_maps,
        num_commanders=num_cmd,
        num_mutations=num_mut,
        num_ais=num_ais,
        total_dim=total_dim,
        bias_row=r,
    )


def feature_embedding_forward(map_ids, commander_ids, mutation_ids, ai_ids,
                              fused, mutation_mask=None, *, max_block=1024):
    """Pallas implementation of FeatureEmbedding.forward (eval mode)."""
    B = map_ids.shape[0]
    M = mutation_ids.shape[1]
    table = fused["table"]
    total_dim = fused["total_dim"]

    # Pack the five narrow id fields into ONE int32 array -> one input DMA.
    packed = jnp.concatenate(
        [
            map_ids.astype(jnp.int32).reshape(B, 1),
            commander_ids.astype(jnp.int32).reshape(B, 2),
            ai_ids.astype(jnp.int32).reshape(B, 1),
            mutation_ids.astype(jnp.int32),
        ],
        axis=1,
    )                                                           # (B, M+4)

    tb = _pick_batch_block(B, max_block)
    grid_b = pl.cdiv(B, tb)
    b_pad = grid_b * tb

    if mutation_mask is None:
        mask_f = jnp.ones((b_pad, M), jnp.float32)
        mask_eps = 0.0          # exact mean over M slots
    else:
        mask_f = mutation_mask.astype(jnp.float32)
        mask_eps = 1e-9
        if b_pad != B:
            mask_f = jnp.pad(mask_f, ((0, b_pad - B), (0, 0)))
    if b_pad != B:
        packed = jnp.pad(packed, ((0, b_pad - B), (0, 0)))      # id 0 is a valid row

    num_maps = fused["num_maps"]
    num_cmd = fused["num_commanders"]
    num_mut = fused["num_mutations"]

    kernel = functools.partial(
        _fused_embedding_kernel,
        off_cmd0=num_maps,
        off_cmd1=num_maps + num_cmd,
        off_mut=num_maps + 2 * num_cmd,
        off_ai=num_maps + 2 * num_cmd + num_mut,
        bias_row=fused["bias_row"],
        mask_eps=mask_eps,
    )

    out = pl.pallas_call(
        kernel,
        out_shape=jax.ShapeDtypeStruct((b_pad, total_dim), jnp.float32),
        grid=(grid_b,),
        in_specs=[
            pl.BlockSpec((tb, M + 4), lambda i: (i, 0)),        # packed ids
            pl.BlockSpec((tb, M), lambda i: (i, 0)),            # mutation mask
            pl.BlockSpec(table.shape, lambda i: (0, 0)),        # fused table (tiny, VMEM)
        ],
        out_specs=pl.BlockSpec((tb, total_dim), lambda i: (i, 0)),
        compiler_params=pltpu.CompilerParams(
            dimension_semantics=("parallel",),
        ),
    )(packed, mask_f, table)

    return out if b_pad == B else out[:B]


def _reference_forward(map_ids, commander_ids, mutation_ids, ai_ids, params,
                       mutation_mask=None):
    """Pure-JAX reference mirroring the torch module (eval mode, f32)."""
    hi = jax.lax.Precision.HIGHEST
    map_e = jnp.take(params["map_table"], map_ids, axis=0)
    cmd_e = jnp.take(params["commander_table"], commander_ids, axis=0)   # (B,2,D)
    combined = jnp.concatenate([cmd_e[:, 0], cmd_e[:, 1]], axis=-1)
    cmd_out = (
        jnp.dot(combined, params["combine_w"], precision=hi)
        + params["combine_b"][0]
    )
    mut_e = jnp.take(params["mutation_table"], mutation_ids, axis=0)     # (B,M,D)
    if mutation_mask is not None:
        m = mutation_mask.astype(jnp.float32)
        mut_out = (mut_e * m[:, :, None]).sum(axis=1) / (
            m.sum(axis=1, keepdims=True) + 1e-9
        )
    else:
        mut_out = mut_e.mean(axis=1)
    ai_e = jnp.take(params["ai_table"], ai_ids, axis=0)
    return jnp.concatenate([map_e, cmd_out, mut_out, ai_e], axis=-1)


if __name__ == "__main__":
    # Small, deterministic configuration.
    num_maps, num_commanders, num_mutations, num_ais = 10, 12, 10, 6
    map_dim, commander_dim, mutation_dim, ai_dim = 32, 48, 48, 16
    B, M = 8, 6   # batch, mutation slots per sample

    key = jax.random.PRNGKey(0)
    keys = jax.random.split(key, 16)

    params = {
        "map_table": jax.random.normal(keys[0], (num_maps, map_dim), jnp.float32),
        "commander_table": jax.random.normal(
            keys[1], (num_commanders, commander_dim), jnp.float32
        ),
        "mutation_table": jax.random.normal(
            keys[2], (num_mutations, mutation_dim), jnp.float32
        ),
        "ai_table": jax.random.normal(keys[3], (num_ais, ai_dim), jnp.float32),
        # torch Linear(2*commander_dim, commander_dim) stored as W^T: x @ W + b
        "combine_w": jax.random.normal(
            keys[4], (2 * commander_dim, commander_dim), jnp.float32
        ) * 0.1,
        "combine_b": jax.random.normal(keys[5], (1, commander_dim), jnp.float32) * 0.1,
    }

    # Built ONCE (model init), reused by every forward call.
    fused = build_fused_feature_embedding(params)

    map_ids = jax.random.randint(keys[6], (B,), 0, num_maps, jnp.int32)
    commander_ids = jax.random.randint(keys[7], (B, 2), 0, num_commanders, jnp.int32)
    mutation_ids = jax.random.randint(keys[8], (B, M), 0, num_mutations, jnp.int32)
    ai_ids = jax.random.randint(keys[9], (B,), 0, num_ais, jnp.int32)
    mutation_mask = jax.random.bernoulli(keys[10], 0.7, (B, M))

    total_dim = map_dim + commander_dim + mutation_dim + ai_dim

    # With mask.
    out_masked = jax.block_until_ready(feature_embedding_forward(
        map_ids, commander_ids, mutation_ids, ai_ids, fused, mutation_mask))
    ref_masked = _reference_forward(
        map_ids, commander_ids, mutation_ids, ai_ids, params, mutation_mask)

    # Without mask (plain mean over the mutation axis).
    out_nomask = jax.block_until_ready(feature_embedding_forward(
        map_ids, commander_ids, mutation_ids, ai_ids, fused, None))
    ref_nomask = _reference_forward(
        map_ids, commander_ids, mutation_ids, ai_ids, params, None)

    assert out_masked.shape == (B, total_dim)
    assert jnp.allclose(out_masked, ref_masked, atol=1e-5, rtol=1e-5)
    assert jnp.allclose(out_nomask, ref_nomask, atol=1e-5, rtol=1e-5)

    # Larger, non-divisible batch exercising the cdiv grid + padding path
    # (tb=504, grid=(2,), 8 padded rows discarded by the wrapper).
    B2 = 1000
    map_ids2 = jax.random.randint(keys[11], (B2,), 0, num_maps, jnp.int32)
    commander_ids2 = jax.random.randint(keys[12], (B2, 2), 0, num_commanders, jnp.int32)
    mutation_ids2 = jax.random.randint(keys[13], (B2, M), 0, num_mutations, jnp.int32)
    ai_ids2 = jax.random.randint(keys[14], (B2,), 0, num_ais, jnp.int32)
    mutation_mask2 = jax.random.bernoulli(keys[15], 0.7, (B2, M))

    out_big = jax.block_until_ready(feature_embedding_forward(
        map_ids2, commander_ids2, mutation_ids2, ai_ids2, fused, mutation_mask2))
    ref_big = _reference_forward(
        map_ids2, commander_ids2, mutation_ids2, ai_ids2, params, mutation_mask2)

    assert out_big.shape == (B2, total_dim)
    assert jnp.allclose(out_big, ref_big, atol=1e-5, rtol=1e-5)

    print("KERNEL_OK")
</pallas_src>

<mosaic_0001>
module attributes {stable_mosaic.version = 11 : i64} {
  func.func @_fused_embedding_kernel(%arg0: i32, %arg1: memref<8x10xi32, #tpu.memory_space<vmem>>, %arg2: memref<8x6xf32, #tpu.memory_space<vmem>>, %arg3: memref<56x144xf32, #tpu.memory_space<vmem>>, %arg4: memref<8x144xf32, #tpu.memory_space<vmem>>) attributes {dimension_semantics = [#tpu.dimension_semantics<parallel>], iteration_bounds = array<i64: 1>, scalar_prefetch = 0 : i64, scratch_operands = 0 : i64, tpu.core_type = #tpu.core_type<tc>, window_params = [{transform_indices = @transform_0, window_bounds = array<i64: 8, 10>}, {transform_indices = @transform_1, window_bounds = array<i64: 8, 6>}, {pipeline_mode = #tpu.pipeline_mode<synchronous>, transform_indices = @transform_2, window_bounds = array<i64: 56, 144>}, {transform_indices = @transform_3, window_bounds = array<i64: 8, 144>}]} {
    %c0 = arith.constant 0 : index
    %c0_0 = arith.constant 0 : index
    %0 = vector.load %arg1[%c0, %c0_0] : memref<8x10xi32, #tpu.memory_space<vmem>>, vector<8x10xi32>
    %1 = tpu.iota {dimensions = array<i32: 1>} : vector<8x56xi32>
    %2 = vector.extract_strided_slice %0 {offsets = [0, 0], sizes = [8, 1], strides = [1, 1]} : vector<8x10xi32> to vector<8x1xi32>
    %3 = vector.broadcast %2 : vector<8x1xi32> to vector<8x56xi32>
    %4 = arith.cmpi eq, %1, %3 : vector<8x56xi32>
    %5 = vector.extract_strided_slice %0 {offsets = [0, 1], sizes = [8, 1], strides = [1, 1]} : vector<8x10xi32> to vector<8x1xi32>
    %c10_i32 = arith.constant 10 : i32
    %6 = vector.broadcast %c10_i32 : i32 to vector<8x1xi32>
    %7 = arith.addi %5, %6 : vector<8x1xi32>
    %8 = vector.broadcast %7 : vector<8x1xi32> to vector<8x56xi32>
    %9 = arith.cmpi eq, %1, %8 : vector<8x56xi32>
    %10 = arith.ori %4, %9 : vector<8x56xi1>
    %11 = vector.extract_strided_slice %0 {offsets = [0, 2], sizes = [8, 1], strides = [1, 1]} : vector<8x10xi32> to vector<8x1xi32>
    %c22_i32 = arith.constant 22 : i32
    %12 = vector.broadcast %c22_i32 : i32 to vector<8x1xi32>
    %13 = arith.addi %11, %12 : vector<8x1xi32>
    %14 = vector.broadcast %13 : vector<8x1xi32> to vector<8x56xi32>
    %15 = arith.cmpi eq, %1, %14 : vector<8x56xi32>
    %16 = arith.ori %10, %15 : vector<8x56xi1>
    %17 = vector.extract_strided_slice %0 {offsets = [0, 3], sizes = [8, 1], strides = [1, 1]} : vector<8x10xi32> to vector<8x1xi32>
    %c44_i32 = arith.constant 44 : i32
    %18 = vector.broadcast %c44_i32 : i32 to vector<8x1xi32>
    %19 = arith.addi %17, %18 : vector<8x1xi32>
    %20 = vector.broadcast %19 : vector<8x1xi32> to vector<8x56xi32>
    %21 = arith.cmpi eq, %1, %20 : vector<8x56xi32>
    %22 = arith.ori %16, %21 : vector<8x56xi1>
    %c50_i32 = arith.constant 50 : i32
    %23 = vector.broadcast %c50_i32 : i32 to vector<8x56xi32>
    %24 = arith.cmpi eq, %1, %23 : vector<8x56xi32>
    %25 = arith.ori %22, %24 : vector<8x56xi1>
    %26 = arith.extui %25 : vector<8x56xi1> to vector<8x56xi32>
    %27 = arith.sitofp %26 : vector<8x56xi32> to vector<8x56xf32>
    %c0_1 = arith.constant 0 : index
    %c0_2 = arith.constant 0 : index
    %28 = vector.load %arg2[%c0_1, %c0_2] : memref<8x6xf32, #tpu.memory_space<vmem>>, vector<8x6xf32>
    %cst = arith.constant dense<0.000000e+00> : vector<8xf32>
    %29 = vector.multi_reduction <add>, %28, %cst [1] : vector<8x6xf32> to vector<8xf32>
    %30 = vector.shape_cast %29 : vector<8xf32> to vector<8x1xf32>
    %cst_3 = arith.constant 9.99999971E-10 : f32
    %31 = vector.broadcast %cst_3 : f32 to vector<8x1xf32>
    %32 = arith.addf %30, %31 : vector<8x1xf32>
    %cst_4 = arith.constant 1.000000e+00 : f32
    %33 = vector.broadcast %cst_4 : f32 to vector<8x1xf32>
    %34 = arith.divf %33, %32 : vector<8x1xf32>
    %35 = vector.extract_strided_slice %28 {offsets = [0, 0], sizes = [8, 1], strides = [1, 1]} : vector<8x6xf32> to vector<8x1xf32>
    %36 = arith.mulf %35, %34 : vector<8x1xf32>
    %37 = vector.extract_strided_slice %0 {offsets = [0, 4], sizes = [8, 1], strides = [1, 1]} : vector<8x10xi32> to vector<8x1xi32>
    %c34_i32 = arith.constant 34 : i32
    %38 = vector.broadcast %c34_i32 : i32 to vector<8x1xi32>
    %39 = arith.addi %37, %38 : vector<8x1xi32>
    %40 = vector.broadcast %39 : vector<8x1xi32> to vector<8x56xi32>
    %41 = arith.cmpi eq, %1, %40 : vector<8x56xi32>
    %42 = arith.extui %41 : vector<8x56xi1> to vector<8x56xi32>
    %43 = arith.sitofp %42 : vector<8x56xi32> to vector<8x56xf32>
    %44 = vector.broadcast %36 : vector<8x1xf32> to vector<8x56xf32>
    %45 = arith.mulf %43, %44 : vector<8x56xf32>
    %46 = arith.addf %27, %45 : vector<8x56xf32>
    %47 = vector.extract_strided_slice %28 {offsets = [0, 1], sizes = [8, 1], strides = [1, 1]} : vector<8x6xf32> to vector<8x1xf32>
    %48 = arith.mulf %47, %34 : vector<8x1xf32>
    %49 = vector.extract_strided_slice %0 {offsets = [0, 5], sizes = [8, 1], strides = [1, 1]} : vector<8x10xi32> to vector<8x1xi32>
    %c34_i32_5 = arith.constant 34 : i32
    %50 = vector.broadcast %c34_i32_5 : i32 to vector<8x1xi32>
    %51 = arith.addi %49, %50 : vector<8x1xi32>
    %52 = vector.broadcast %51 : vector<8x1xi32> to vector<8x56xi32>
    %53 = arith.cmpi eq, %1, %52 : vector<8x56xi32>
    %54 = arith.extui %53 : vector<8x56xi1> to vector<8x56xi32>
    %55 = arith.sitofp %54 : vector<8x56xi32> to vector<8x56xf32>
    %56 = vector.broadcast %48 : vector<8x1xf32> to vector<8x56xf32>
    %57 = arith.mulf %55, %56 : vector<8x56xf32>
    %58 = arith.addf %46, %57 : vector<8x56xf32>
    %59 = vector.extract_strided_slice %28 {offsets = [0, 2], sizes = [8, 1], strides = [1, 1]} : vector<8x6xf32> to vector<8x1xf32>
    %60 = arith.mulf %59, %34 : vector<8x1xf32>
    %61 = vector.extract_strided_slice %0 {offsets = [0, 6], sizes = [8, 1], strides = [1, 1]} : vector<8x10xi32> to vector<8x1xi32>
    %c34_i32_6 = arith.constant 34 : i32
    %62 = vector.broadcast %c34_i32_6 : i32 to vector<8x1xi32>
    %63 = arith.addi %61, %62 : vector<8x1xi32>
    %64 = vector.broadcast %63 : vector<8x1xi32> to vector<8x56xi32>
    %65 = arith.cmpi eq, %1, %64 : vector<8x56xi32>
    %66 = arith.extui %65 : vector<8x56xi1> to vector<8x56xi32>
    %67 = arith.sitofp %66 : vector<8x56xi32> to vector<8x56xf32>
    %68 = vector.broadcast %60 : vector<8x1xf32> to vector<8x56xf32>
    %69 = arith.mulf %67, %68 : vector<8x56xf32>
    %70 = arith.addf %58, %69 : vector<8x56xf32>
    %71 = vector.extract_strided_slice %28 {offsets = [0, 3], sizes = [8, 1], strides = [1, 1]} : vector<8x6xf32> to vector<8x1xf32>
    %72 = arith.mulf %71, %34 : vector<8x1xf32>
    %73 = vector.extract_strided_slice %0 {offsets = [0, 7], sizes = [8, 1], strides = [1, 1]} : vector<8x10xi32> to vector<8x1xi32>
    %c34_i32_7 = arith.constant 34 : i32
    %74 = vector.broadcast %c34_i32_7 : i32 to vector<8x1xi32>
    %75 = arith.addi %73, %74 : vector<8x1xi32>
    %76 = vector.broadcast %75 : vector<8x1xi32> to vector<8x56xi32>
    %77 = arith.cmpi eq, %1, %76 : vector<8x56xi32>
    %78 = arith.extui %77 : vector<8x56xi1> to vector<8x56xi32>
    %79 = arith.sitofp %78 : vector<8x56xi32> to vector<8x56xf32>
    %80 = vector.broadcast %72 : vector<8x1xf32> to vector<8x56xf32>
    %81 = arith.mulf %79, %80 : vector<8x56xf32>
    %82 = arith.addf %70, %81 : vector<8x56xf32>
    %83 = vector.extract_strided_slice %28 {offsets = [0, 4], sizes = [8, 1], strides = [1, 1]} : vector<8x6xf32> to vector<8x1xf32>
    %84 = arith.mulf %83, %34 : vector<8x1xf32>
    %85 = vector.extract_strided_slice %0 {offsets = [0, 8], sizes = [8, 1], strides = [1, 1]} : vector<8x10xi32> to vector<8x1xi32>
    %c34_i32_8 = arith.constant 34 : i32
    %86 = vector.broadcast %c34_i32_8 : i32 to vector<8x1xi32>
    %87 = arith.addi %85, %86 : vector<8x1xi32>
    %88 = vector.broadcast %87 : vector<8x1xi32> to vector<8x56xi32>
    %89 = arith.cmpi eq, %1, %88 : vector<8x56xi32>
    %90 = arith.extui %89 : vector<8x56xi1> to vector<8x56xi32>
    %91 = arith.sitofp %90 : vector<8x56xi32> to vector<8x56xf32>
    %92 = vector.broadcast %84 : vector<8x1xf32> to vector<8x56xf32>
    %93 = arith.mulf %91, %92 : vector<8x56xf32>
    %94 = arith.addf %82, %93 : vector<8x56xf32>
    %95 = vector.extract_strided_slice %28 {offsets = [0, 5], sizes = [8, 1], strides = [1, 1]} : vector<8x6xf32> to vector<8x1xf32>
    %96 = arith.mulf %95, %34 : vector<8x1xf32>
    %97 = vector.extract_strided_slice %0 {offsets = [0, 9], sizes = [8, 1], strides = [1, 1]} : vector<8x10xi32> to vector<8x1xi32>
    %c34_i32_9 = arith.constant 34 : i32
    %98 = vector.broadcast %c34_i32_9 : i32 to vector<8x1xi32>
    %99 = arith.addi %97, %98 : vector<8x1xi32>
    %100 = vector.broadcast %99 : vector<8x1xi32> to vector<8x56xi32>
    %101 = arith.cmpi eq, %1, %100 : vector<8x56xi32>
    %102 = arith.extui %101 : vector<8x56xi1> to vector<8x56xi32>
    %103 = arith.sitofp %102 : vector<8x56xi32> to vector<8x56xf32>
    %104 = vector.broadcast %96 : vector<8x1xf32> to vector<8x56xf32>
    %105 = arith.mulf %103, %104 : vector<8x56xf32>
    %106 = arith.addf %94, %105 : vector<8x56xf32>
    %c0_10 = arith.constant 0 : index
    %c0_11 = arith.constant 0 : index
    %107 = vector.load %arg3[%c0_10, %c0_11] : memref<56x144xf32, #tpu.memory_space<vmem>>, vector<56x144xf32>
    %cst_12 = arith.constant dense<0.000000e+00> : vector<8x144xf32>
    %108 = tpu.matmul %106, %107, %cst_12 {dimension_numbers = #tpu.dot_dimension_numbers<[1], [0], [0], [1], [0, 0, 1, 1], [], []>} : vector<8x56xf32>, vector<56x144xf32>, vector<8x144xf32> -> vector<8x144xf32>
    %c0_13 = arith.constant 0 : index
    %c0_14 = arith.constant 0 : index
    %109 = vector.load %arg4[%c0_13, %c0_14] : memref<8x144xf32, #tpu.memory_space<vmem>>, vector<8x144xf32>
    tpu.vector_store %arg4[%c0_13, %c0_14], %108 {strides = array<i32>} : memref<8x144xf32, #tpu.memory_space<vmem>>, vector<8x144xf32>,
    return
  }
  func.func @transform_0(%arg0: i32) -> (i32, i32) {
    %c0_i32 = arith.constant 0 : i32
    %c0_i32_0 = arith.constant 0 : i32
    return %arg0, %c0_i32 : i32, i32
  }
  func.func @transform_1(%arg0: i32) -> (i32, i32) {
    %c0_i32 = arith.constant 0 : i32
    %c0_i32_0 = arith.constant 0 : i32
    return %arg0, %c0_i32 : i32, i32
  }
  func.func @transform_2(%arg0: i32) -> (i32, i32) {
    %c0_i32 = arith.constant 0 : i32
    %c0_i32_0 = arith.constant 0 : i32
    %c0_i32_1 = arith.constant 0 : i32
    return %c0_i32, %c0_i32_0 : i32, i32
  }
  func.func @transform_3(%arg0: i32) -> (i32, i32) {
    %c0_i32 = arith.constant 0 : i32
    %c0_i32_0 = arith.constant 0 : i32
    return %arg0, %c0_i32 : i32, i32
  }
}

</mosaic_0001>

<bundles_post_ra>
// kernel: tpu_custom_call.1
= control target key start
LH: loop header
LB: loop body
LE: loop exit
PB: predicated region body
PF: predicated region fallthrough
CT: control target
= control target key end

     0   :  { %8 = vsyncpa [#allocation3], 0  ;;  %s515_s0 = inlined_call_operand.hbm [shape: s32[8,10], index: 0, kind: input, shape index: {}]   ;;  %s516_s1 = inlined_call_operand.hbm [shape: f32[8,6], index: 1, kind: input, shape index: {}]   ;;  %s517_s2 = inlined_call_operand.hbm [shape: f32[56,144], index: 2, kind: input, shape index: {}]   ;;  %s518_s3 = inlined_call_operand.hbm [shape: f32[8,144], index: 3, kind: output, shape index: {}]  }
   0x1   :  { %9 = vsyncpa [#allocation6], 0 }
   0x2   :  { %10 = vsyncpa [#allocation4], 0  ;;  %s422_s12 = smov [#allocation5]   ;;  %s423_s14 = smov [#allocation2]  }
   0x3   :  { %s27_s13 = sshll.u32 %s422_s12, 4  ;;  %s17_s15 = sshll.u32 %s423_s14, 4  ;;  %s28_s13 = int_to_ptr.vmem [resolvable:$true] %s27_s13  ;;  %s18_s15 = int_to_ptr.vmem [resolvable:$true] %s17_s15 }
   0x4   :  { %s328_s18 = scalar_lea.hbm %s516_s1, 128 }
   0x5   :  { %p329_p0 = scmp.ne.s32.totalorder %s516_s1, %s328_s18  ;;  %p332_p1 = scmp.lt.u32.totalorder %s328_s18, %s516_s1 }
   0x7   :  { %p334_p2 = pnand %p332_p1, %p329_p0 }
   0x9   :  { %337 = shalt.err (!%p334_p2)
}
   0xa   :  { %s338_s23 = scalar_lea.vmem %s28_s13, 128  ;;  %p343_p4 = scmp.lt.s32.totalorder %s28_s13, %s28_s13 }
   0xb   :  { %p339_p3 = scmp.ne.s32.totalorder %s28_s13, %s338_s23  ;;  %p344_p5 = scmp.lt.s32.totalorder %s338_s23, %s338_s23 }
   0xd   :  { %p345_p6 = por %p344_p5, %p343_p4 }
   0xf   :  { %p346_p7 = pnand %p345_p6, %p339_p3 }
  0x11   :  { %349 = shalt.err (!%p346_p7)
}
  0x12   :  { %30 = dma.hbm_to_vmem [thread:$0]  %s516_s1, 128, %s28_s13, [#allocation6]  }
  0x13   :  { %s350_s28 = scalar_lea.hbm %s515_s0, 128 }
  0x14   :  { %p351_p8 = scmp.ne.s32.totalorder %s515_s0, %s350_s28  ;;  %p354_p9 = scmp.lt.u32.totalorder %s350_s28, %s515_s0 }
  0x16   :  { %p356_p10 = pnand %p354_p9, %p351_p8 }
  0x18   :  { %359 = shalt.err (!%p356_p10)
}
  0x19   :  { %s360_s6 = scalar_lea.vmem %s18_s15, 128  ;;  %p365_p12 = scmp.lt.s32.totalorder %s18_s15, %s18_s15 }
  0x1a   :  { %p361_p11 = scmp.ne.s32.totalorder %s18_s15, %s360_s6  ;;  %p366_p13 = scmp.lt.s32.totalorder %s360_s6, %s360_s6 }
  0x1c   :  { %p367_p0 = por %p366_p13, %p365_p12 }
  0x1e   :  { %p368_p1 = pnand %p367_p0, %p361_p11 }
  0x20   :  { %371 = shalt.err (!%p368_p1)
}
  0x21   :  { %20 = dma.hbm_to_vmem [thread:$0]  %s515_s0, 128, %s18_s15, [#allocation3]  }
  0x22   :  { %s424_s8 = smov [#allocation7]   ;;  %s372_s12 = scalar_lea.hbm %s517_s2, 1792 }
  0x23   :  { %s36_s9 = sshll.u32 %s424_s8, 4  ;;  %p373_p2 = scmp.ne.s32.totalorder %s517_s2, %s372_s12  ;;  %s37_s9 = int_to_ptr.vmem [resolvable:$true] %s36_s9 }
  0x24   :  { %p376_p3 = scmp.lt.u32.totalorder %s372_s12, %s517_s2 }
  0x26   :  { %p378_p4 = pnand %p376_p3, %p373_p2 }
  0x28   :  { %381 = shalt.err (!%p378_p4)
}
  0x29   :  { %s382_s18 = scalar_lea.vmem %s37_s9, 1792  ;;  %p387_p6 = scmp.lt.s32.totalorder %s37_s9, %s37_s9 }
  0x2a   :  { %p383_p5 = scmp.ne.s32.totalorder %s37_s9, %s382_s18  ;;  %p388_p7 = scmp.lt.s32.totalorder %s382_s18, %s382_s18 }
  0x2c   :  { %p389_p8 = por %p388_p7, %p387_p6 }
  0x2e   :  { %p390_p9 = pnand %p389_p8, %p383_p5 }
  0x30   :  { %393 = shalt.err (!%p390_p9)
}
  0x31   :  { %s425_s0 = smov 256   ;;  %s426_s15 = smov 16  }
  0x32   :  { %42 = dma.hbm_to_vmem [thread:$0]  %s517_s2, 1792, %s37_s9, [#allocation6], %s425_s0, %s425_s0, %s426_s15  }
  0x33   :  { %416 = dma.done.wait [#allocation3], 128  }
  0x34   :  { %417 = vsyncadd [#allocation3], 4294967168 }
  0x35   :  { %418 = dma.done.wait [#allocation6], 1920  }
  0x36   :  { %419 = vsyncadd [#allocation6], 4294965376  ;;  %v427_v0 = vmov 1   ;;  %v428_v1 = vmov 0   ;;  %vm82_vm0 = vcmask 48128   ;;  %v81_v2 = vld [vmem:[#allocation5] sm:$0xff]  ;;  %v53_v49 = vlaneseq }
  0x37   :  { %310 = vset.pattern.permute.xlu1 %v427_v0  ;;  %309 = vset.pattern.permute.xlu0 %v428_v1  ;;  %v52_v3 = vld [vmem:[#allocation2] sm:$0xff]  ;;  %v83_v4 = vsel %vm82_vm0, %v81_v2, 0.0  ;;  %v429_v7 = vmov 2   ;;  %v430_v9 = vmov 3   ;;  %v431_v11 = vmov 4   ;;  %v165_v21 = vld [vmem:[#allocation7 + $0x8] sm:$0xff] }
  0x38   :  { %v59_v5 = vadd.s32 10, %v52_v3  ;;  %84 = vadd.xlane.f32.xlu0 %v83_v4  ;;  %v65_v6 = vadd.s32 22, %v52_v3  ;;  %v71_v8 = vadd.s32 44, %v52_v3  ;;  %v90_v10 = vadd.s32 34, %v52_v3  ;;  %v167_v22 = vld [vmem:[#allocation7 + $0x18] sm:$0xff]  ;;  %v164_v24 = vld [vmem:[#allocation7] sm:$0xff] }
  0x39   :  { %v432_v12 = vmov 5   ;;  %v433_v13 = vmov 6   ;;  %v434_v14 = vmov 7   ;;  %v435_v15 = vmov 8   ;;  %v166_v25 = vld [vmem:[#allocation7 + $0x10] sm:$0xff]  ;;  %v169_v27 = vld [vmem:[#allocation7 + $0x28] sm:$0xff] }
  0x3a   :  { %61 = vperm.xlu1 %310, %v59_v5   ;;  %v436_v16 = vmov 0.0   ;;  %v280_v23 = vpack.c.bf16 %v167_v22, %v165_v21  ;;  %v282_v26 = vpack.c.bf16 %v166_v25, %v164_v24  ;;  %v171_v28 = vld [vmem:[#allocation7 + $0x38] sm:$0xff]  ;;  %v168_v30 = vld [vmem:[#allocation7 + $0x20] sm:$0xff]  ;;  %v170_v31 = vld [vmem:[#allocation7 + $0x30] sm:$0xff]  ;;  %v437_v33 = vmov 9   ;;  %s438_s2 = smov [#allocation8]  }
  0x3b   :  { %246 = vmatprep.mubr.f32.mxu0 %v436_v16  ;;  %v284_v29 = vpack.c.bf16 %v171_v28, %v169_v27  ;;  %v286_v32 = vpack.c.bf16 %v170_v31, %v168_v30  ;;  %v173_v34 = vld [vmem:[#allocation7 + $0x48] sm:$0xff]  ;;  %v175_v35 = vld [vmem:[#allocation7 + $0x58] sm:$0xff]  ;;  %v172_v36 = vld [vmem:[#allocation7 + $0x40] sm:$0xff]  ;;  %v54_v51 = vand.u32 127, %v53_v49  ;;  %vm178_vm0 = vcmask 457728   ;;  %s262_s21 = sshll.u32 %s438_s2, 4  ;;  %s263_s21 = int_to_ptr.vmem [resolvable:$true] %s262_s21 }
  0x3c   :  { %281 = vmatprep.subr.bf16.mxu0 %v280_v23  ;;  %v288_v37 = vpack.c.bf16 %v175_v35, %v173_v34  ;;  %v174_v38 = vld [vmem:[#allocation7 + $0x50] sm:$0xff]  ;;  %v177_v40 = vld [vmem:[#allocation7 + $0x68] sm:$0xff]  ;;  %v176_v41 = vld [vmem:[#allocation7 + $0x60] sm:$0xff]  ;;  %s394_s22 = scalar_lea.vmem %s263_s21, 256  ;;  %p399_p11 = scmp.lt.s32.totalorder %s263_s21, %s263_s21 }
  0x3d   :  { %283 = vmatpush1.bf16.msra.mxu0 %v282_v26  ;;  %v290_v39 = vpack.c.bf16 %v174_v38, %v172_v36  ;;  %vm77_vm8 = vcmp.eq.s32.totalorder %v54_v51, 50  ;;  %p395_p10 = scmp.ne.s32.totalorder %s263_s21, %s394_s22  ;;  %p400_p12 = scmp.lt.s32.totalorder %s394_s22, %s394_s22 }
  0x3e   :  { %311 = vset.pattern.permute.xlu1 %v429_v7  ;;  %285 = vmatprep.subr.bf16.mxu0 %v284_v29 }
  0x3f   :  { %67 = vperm.xlu1 %311, %v65_v6   ;;  %p401_p13 = por %p400_p12, %p399_p11 }
  0x41   :  { %287 = vmatpush1.bf16.msra.mxu0 %v286_v32  ;;  %p402_p0 = pnand %p401_p13, %p395_p10 }
  0x42   :  { %289 = vmatprep.subr.bf16.mxu0 %v288_v37 }
  0x43   :  { %312 = vset.pattern.permute.xlu1 %v430_v9 }
  0x44   :  { %73 = vperm.xlu1 %312, %v71_v8  }
  0x45   :  { %291 = vmatpush1.bf16.msra.mxu0 %v290_v39 }
  0x46   :  { %194 = vmatprep.subr.mxu0 %v177_v40 }
  0x48   :  { %313 = vset.pattern.permute.xlu1 %v431_v11 }
  0x49   :  { %92 = vperm.xlu1 %313, %v90_v10   ;;  %195 = vmatpush1.msra.mxu0 %v176_v41 }
  0x4d   :  { %314 = vset.pattern.permute.xlu1 %v432_v12 }
  0x4e   :  { %105 = vperm.xlu1 %314, %v90_v10   ;;  %56 = vperm.xlu0 %309, %v52_v3  }
  0x52   :  { %315 = vset.pattern.permute.xlu1 %v433_v13  ;;  %322 = vset.pattern.permute.xlu0 %v431_v11 }
  0x53   :  { %117 = vperm.xlu1 %315, %v90_v10  }
  0x57   :  { %316 = vset.pattern.permute.xlu1 %v434_v14 }
  0x58   :  { %129 = vperm.xlu1 %316, %v90_v10  }
  0x5c   :  { %317 = vset.pattern.permute.xlu1 %v435_v15 }
  0x5d   :  { %141 = vperm.xlu1 %317, %v90_v10  }
  0x61   :  { %318 = vset.pattern.permute.xlu1 %v428_v1 }
  0xb9   :  { %v62_v42 = vpop.permute.xlu1 %61 }
  0xba   :  { %vm63_vm1 = vcmp.eq.s32.totalorder %v54_v51, %v62_v42 }
  0xbe   :  { %v68_v43 = vpop.permute.xlu1 %67 }
  0xbf   :  { %vm69_vm3 = vcmp.eq.s32.totalorder %v54_v51, %v68_v43 }
  0xc3   :  { %v74_v44 = vpop.permute.xlu1 %73 }
  0xc4   :  { %vm75_vm6 = vcmp.eq.s32.totalorder %v54_v51, %v74_v44 }
  0xc5   :  { %v85_v17 = vpop.xlane.xlu0 %84 }
  0xc6   :  { %v86_v18 = vadd.f32 1e-09, %v85_v17 }
  0xc8   :  { %326 = vrcp.f32 %v86_v18  ;;  %v93_v45 = vpop.permute.xlu1 %92 }
  0xc9   :  { %vm94_vm7 = vcmp.eq.s32.totalorder %v54_v51, %v93_v45 }
  0xca   :  { %v273_v56 = vsel %vm94_vm7, 1.0, %v436_v16 }
  0xcd   :  { %v106_v46 = vpop.permute.xlu1 %105  ;;  %v57_v52 = vpop.permute.xlu0 %56 }
  0xce   :  { %vm58_vm2 = vcmp.eq.s32.totalorder %v54_v51, %v57_v52  ;;  %vm107_vm10 = vcmp.eq.s32.totalorder %v54_v51, %v106_v46 }
  0xcf   :  { %vm64_vm4 = vmor %vm58_vm2, %vm63_vm1  ;;  %v274_v58 = vsel %vm107_vm10, 1.0, %v436_v16  ;;  %vm254_vm1 = vcmask 130048  }
  0xd0   :  { %vm70_vm5 = vmor %vm64_vm4, %vm69_vm3 }
  0xd1   :  { %vm76_vm9 = vmor %vm70_vm5, %vm75_vm6 }
  0xd2   :  { %v327_v19 = vpop.eup %326  ;;  %v118_v47 = vpop.permute.xlu1 %117  ;;  %vm78_vm11 = vmor %vm76_vm9, %vm77_vm8 }
  0xd3   :  { %v89_v20 = vmul.f32 %v327_v19, %v81_v2  ;;  %vm119_vm12 = vcmp.eq.s32.totalorder %v54_v51, %v118_v47  ;;  %v272_v60 = vsel %vm78_vm11, 1.0, %v436_v16 }
  0xd4   :  { %v275_v61 = vsel %vm119_vm12, 1.0, %v436_v16 }
  0xd5   :  { %147 = vperm.xlu0 %322, %v89_v20   ;;  %99 = vperm.xlu1 %318, %v89_v20  }
  0xd7   :  { %v130_v48 = vpop.permute.xlu1 %129 }
  0xd8   :  { %vm131_vm13 = vcmp.eq.s32.totalorder %v54_v51, %v130_v48 }
  0xd9   :  { %319 = vset.pattern.permute.xlu1 %v427_v0  ;;  %325 = vset.pattern.permute.xlu0 %v432_v12  ;;  %v276_v1 = vsel %vm131_vm13, 1.0, %v436_v16 }
  0xda   :  { %111 = vperm.xlu1 %319, %v89_v20  }
  0xdc   :  { %v142_v50 = vpop.permute.xlu1 %141 }
  0xdd   :  { %vm143_vm14 = vcmp.eq.s32.totalorder %v54_v51, %v142_v50 }
  0xde   :  { %320 = vset.pattern.permute.xlu1 %v429_v7  ;;  %v277_v8 = vsel %vm143_vm14, 1.0, %v436_v16 }
  0xdf   :  { %123 = vperm.xlu1 %320, %v89_v20  }
  0xe3   :  { %321 = vset.pattern.permute.xlu1 %v430_v9 }
  0xe4   :  { %135 = vperm.xlu1 %321, %v89_v20  }
  0xe8   :  { %323 = vset.pattern.permute.xlu1 %v437_v33 }
  0xe9   :  { %153 = vperm.xlu1 %323, %v90_v10  }
  0xed   :  { %324 = vset.pattern.permute.xlu1 %v432_v12 }
  0xee   :  { %159 = vperm.xlu1 %324, %v89_v20  }
 0x154   :  { %v100_v53 = vpop.permute.xlu1 %99  ;;  %v148_v6 = vpop.permute.xlu0 %147 }
 0x155   :  { %v102_v57 = vmul.f32 %v273_v56, %v100_v53  ;;  %v150_v9 = vmul.f32 %v277_v8, %v148_v6 }
 0x157   :  { %v103_v63 = vadd.f32 %v272_v60, %v102_v57 }
 0x159   :  { %v112_v54 = vpop.permute.xlu1 %111 }
 0x15a   :  { %v114_v59 = vmul.f32 %v274_v58, %v112_v54 }
 0x15c   :  { %v115_v2 = vadd.f32 %v114_v59, %v103_v63 }
 0x15e   :  { %v124_v55 = vpop.permute.xlu1 %123 }
 0x15f   :  { %v126_v0 = vmul.f32 %v275_v61, %v124_v55 }
 0x161   :  { %v127_v4 = vadd.f32 %v126_v0, %v115_v2 }
 0x163   :  { %v136_v62 = vpop.permute.xlu1 %135 }
 0x164   :  { %v138_v3 = vmul.f32 %v276_v1, %v136_v62 }
 0x166   :  { %v139_v7 = vadd.f32 %v138_v3, %v127_v4 }
 0x168   :  { %v154_v5 = vpop.permute.xlu1 %153  ;;  %v151_v12 = vadd.f32 %v150_v9, %v139_v7 }
 0x169   :  { %vm155_vm15 = vcmp.eq.s32.totalorder %v54_v51, %v154_v5 }
 0x16a   :  { %v278_v10 = vsel %vm155_vm15, 1.0, %v436_v16 }
 0x16d   :  { %v160_v11 = vpop.permute.xlu1 %159 }
 0x16e   :  { %v162_v13 = vmul.f32 %v278_v10, %v160_v11 }
 0x170   :  { %v163_v14 = vadd.f32 %v162_v13, %v151_v12 }
 0x172   :  { %279 = vmatmul.mubr.msk.f32.vlgmr.msra.gmra.mrb[0].mxu0 %vm178_vm0, %v163_v14 }
 0x245   :  { %v248_v15 = vpop.f32.mrb[0].mxu0 }
 0x246   :  { %253 = vst [vmem:[#allocation8] sm:$0xff] %v248_v15  ;;  %v250_v17 = vpop.f32.mrb[1].mxu0 }
 0x247   :  { %255 = vst.msk [vmem:[#allocation8 + $0x8] sm:$0xff] %vm254_vm1, %v250_v17 }
 0x248   :  { %405 = shalt.err (!%p402_p0)
}
 0x249   :  { %s406_s25 = scalar_lea.hbm %s518_s3, 256 }
 0x24a   :  { %p407_p1 = scmp.ne.s32.totalorder %s518_s3, %s406_s25  ;;  %p410_p2 = scmp.lt.u32.totalorder %s406_s25, %s518_s3 }
 0x24c   :  { %p412_p3 = pnand %p410_p2, %p407_p1 }
 0x24e   :  { %415 = shalt.err (!%p412_p3)
}
 0x24f   :  { %265 = dma.vmem_to_hbm [thread:$0]  %s263_s21, 256, %s518_s3, [#allocation4]  }
 0x250   :  { %420 = dma.done.wait [#allocation4], 256  }
 0x251   :  { %421 = vsyncadd [#allocation4], 4294967040 }
 0x252   :  { %269 = vsyncpa [#allocation3], 1 }
 0x253   :  { %270 = vsyncpa [#allocation6], 1 }
 0x254   :  { %271 = vsyncpa [#allocation4], 1 }

</bundles_post_ra>
